<compile_context>
chip_gen: v6e
topology: v6e:2x2x1
jax: 0.10.0
libtpu: 0.0.40
codegen_flags: <defaults>
</compile_context>

<pallas_src>
import functools

import numpy as np
import jax
import jax.numpy as jnp
from jax.experimental import pallas as pl
from jax.experimental.pallas import tpu as pltpu

WAVELENGTHS = ((5, 30), (110, 123), (0.01, 5000), (100, 1600))
EMB_DIM = 500          # module default; must be % 10 == 0
EPS_DEFAULT = 0.0001   # LambdaLayer default eps


def _round_up(n, m):
    return ((n + m - 1) // m) * m


def _build_init_arrays(wavelengths=WAVELENGTHS, emb_dim=EMB_DIM):
    """Replicates PositionEmbeddingVs30.__init__ exactly (numpy)."""
    min_lat, max_lat = wavelengths[0]
    min_lon, max_lon = wavelengths[1]
    min_depth, max_depth = wavelengths[2]
    min_vs30, max_vs30 = wavelengths[3]
    assert emb_dim % 10 == 0
    lat_dim = emb_dim // 5
    lon_dim = emb_dim // 5
    depth_dim = emb_dim // 10
    vs30_dim = emb_dim // 10
    lat_coeff = 2 * np.pi / min_lat * (min_lat / max_lat) ** (np.arange(lat_dim) / lat_dim)
    lon_coeff = 2 * np.pi / min_lon * (min_lon / max_lon) ** (np.arange(lon_dim) / lon_dim)
    depth_coeff = 2 * np.pi / min_depth * (min_depth / max_depth) ** (np.arange(depth_dim) / depth_dim)
    vs30_coeff = 2 * np.pi / min_vs30 * (min_vs30 / max_vs30) ** (np.arange(vs30_dim) / vs30_dim)

    mask = np.zeros(emb_dim)
    lat_sin_mask = np.arange(emb_dim) % 5 == 0
    lat_cos_mask = np.arange(emb_dim) % 5 == 1
    lon_sin_mask = np.arange(emb_dim) % 5 == 2
    lon_cos_mask = np.arange(emb_dim) % 5 == 3
    depth_sin_mask = np.arange(emb_dim) % 10 == 4
    depth_cos_mask = np.arange(emb_dim) % 10 == 9
    vs30_sin_mask = np.arange(emb_dim) % 10 == 5
    vs30_cos_mask = np.arange(emb_dim) % 10 == 8
    mask[lat_sin_mask] = np.arange(lat_dim)
    mask[lat_cos_mask] = lat_dim + np.arange(lat_dim)
    mask[lon_sin_mask] = 2 * lat_dim + np.arange(lon_dim)
    mask[lon_cos_mask] = 2 * lat_dim + lon_dim + np.arange(lon_dim)
    mask[depth_sin_mask] = 2 * lat_dim + 2 * lon_dim + np.arange(depth_dim)
    mask[depth_cos_mask] = 2 * lat_dim + 2 * lon_dim + depth_dim + np.arange(depth_dim)
    mask[vs30_sin_mask] = 2 * lat_dim + 2 * lon_dim + 2 * depth_dim + np.arange(vs30_dim)
    mask[vs30_cos_mask] = 2 * lat_dim + 2 * lon_dim + 2 * depth_dim + vs30_dim + np.arange(vs30_dim)
    mask = mask.astype('int32')

    coeffs = (lat_coeff, lon_coeff, depth_coeff, vs30_coeff)
    dims = (lat_dim, lon_dim, depth_dim, vs30_dim)
    return coeffs, dims, mask


def build_kernel_params(wavelengths=WAVELENGTHS, emb_dim=EMB_DIM):
    """Folds the constant torch.cat + torch.gather permutation and the
    cos->sin phase shift into:
      W     : (4, emb_dim)  one nonzero coefficient per output column
      phase : (1, emb_dim)  pi/2 where the slot is a cos, 0 where sin
    so the kernel computes  sin(x0 @ W + phase) + eps."""
    (lat_c, lon_c, dep_c, vs_c), (lat_d, lon_d, dep_d, vs_d), mask = _build_init_arrays(
        wavelengths, emb_dim)
    coeff_cat = np.concatenate([lat_c, lat_c, lon_c, lon_c, dep_c, dep_c, vs_c, vs_c])
    feat_cat = np.concatenate([np.full(lat_d, 0), np.full(lat_d, 0),
                               np.full(lon_d, 1), np.full(lon_d, 1),
                               np.full(dep_d, 2), np.full(dep_d, 2),
                               np.full(vs_d, 3), np.full(vs_d, 3)])
    iscos_cat = np.concatenate([np.zeros(lat_d), np.ones(lat_d),
                                np.zeros(lon_d), np.ones(lon_d),
                                np.zeros(dep_d), np.ones(dep_d),
                                np.zeros(vs_d), np.ones(vs_d)])
    coeff_out = coeff_cat[mask].astype(np.float32)   # matches torch.Tensor(coeff) cast
    feat_out = feat_cat[mask].astype(np.int64)
    iscos_out = iscos_cat[mask]

    W = np.zeros((4, emb_dim), dtype=np.float32)
    W[feat_out, np.arange(emb_dim)] = coeff_out
    phase = (iscos_out * (np.pi / 2)).astype(np.float32)[None, :]   # (1, emb_dim)
    return jnp.asarray(W), jnp.asarray(phase)


def _pos_emb_kernel(x_ref, w_ref, p_ref, o_ref, *, eps):
    # x_ref: [TB, 4]   station-0 features (lat, lon, depth, vs30)
    # w_ref: [4, E]    permuted coefficients (one nonzero per output column)
    # p_ref: [1, E]    phase row (pi/2 on cos slots)
    # o_ref: [TB, E]
    # MXU contraction builds the sine argument; precision=HIGHEST keeps it
    # f32-accurate (arguments can reach ~1e3 with real depth/vs30 scales).
    base = jnp.dot(x_ref[...], w_ref[...],
                   preferred_element_type=jnp.float32,
                   precision=jax.lax.Precision.HIGHEST)
    # One phase-shifted sine per element (cos folded in via the phase row);
    # LambdaLayer's "+ eps" is fused into the epilogue.
    o_ref[...] = (jnp.sin(base + p_ref[...]) + eps).astype(o_ref.dtype)


def lambda_layer_forward(x, W, phase, *, eps=EPS_DEFAULT,
                         min_pallas_batch=64, max_tile_b=512,
                         out_dtype=jnp.float32):
    """LambdaLayer(lambd=PositionEmbeddingVs30, eps).forward(x).

    x: [B, S, 4] float32 -> [B, 1, emb_dim] (PyTorch-exact semantics: the
    gather index expanded to (B, 1, emb_dim) means only station 0 is read).

    out_dtype=jnp.bfloat16 is available to halve output HBM traffic (mainly
    useful on v5e) but loosens accuracy to ~3e-3 relative.
    """
    B = x.shape[0]
    E = W.shape[1]
    x0 = x[:, 0, :].astype(jnp.float32)                         # [B, 4]

    # Tiny batches: pallas_call launch + row padding overhead dominates the
    # few hundred ns of real work; let XLA fuse the trivial op instead.
    if B < min_pallas_batch:
        base = x0 @ W + phase
        return (jnp.sin(base) + eps).astype(out_dtype)[:, None, :]

    # Sublane-dense rows; tile up to max_tile_b rows, and (when the batch
    # allows it) pick tile_b so the grid has >= 2 steps so v7x's two
    # TensorCores both get work via dimension_semantics=("parallel",).
    b8 = _round_up(B, 8)
    tile_b = min(b8, max_tile_b)
    if b8 >= 16 and -(-b8 // tile_b) < 2:
        tile_b = _round_up(-(-b8 // 2), 8)
    b_pad = _round_up(b8, tile_b)
    x_pad = x0 if b_pad == B else jnp.pad(x0, ((0, b_pad - B), (0, 0)))

    out = pl.pallas_call(
        functools.partial(_pos_emb_kernel, eps=float(eps)),
        out_shape=jax.ShapeDtypeStruct((b_pad, E), out_dtype),
        grid=(b_pad // tile_b,),
        in_specs=[
            pl.BlockSpec((tile_b, 4), lambda i: (i, 0)),   # x rows (full last dim)
            pl.BlockSpec((4, E), lambda i: (0, 0)),        # coefficients (resident)
            pl.BlockSpec((1, E), lambda i: (0, 0)),        # phase row    (resident)
        ],
        out_specs=pl.BlockSpec((tile_b, E), lambda i: (i, 0)),
        compiler_params=pltpu.CompilerParams(
            dimension_semantics=("parallel",)),            # shard tiles across TCs
    )(x_pad, W, phase)

    # Only trim padded rows (padded rows are benign: sin(phase) + eps).
    # No lane slice: the kernel already wrote the true emb_dim width.
    out = out if b_pad == B else out[:B]
    return out[:, None, :]


def reference_forward(x_np, eps=EPS_DEFAULT, wavelengths=WAVELENGTHS, emb_dim=EMB_DIM):
    """Literal numpy transcription of LambdaLayer(PositionEmbeddingVs30).forward."""
    (lat_c, lon_c, dep_c, vs_c), _, mask = _build_init_arrays(wavelengths, emb_dim)
    lat_c, lon_c, dep_c, vs_c = (c.astype(np.float32) for c in (lat_c, lon_c, dep_c, vs_c))
    x = x_np.astype(np.float32)
    lat_base = x[:, :, 0:1] * lat_c
    lon_base = x[:, :, 1:2] * lon_c
    depth_base = x[:, :, 2:3] * dep_c
    vs30_base = x[:, :, 3:4] * vs_c
    output = np.concatenate(
        [np.sin(lat_base), np.cos(lat_base),
         np.sin(lon_base), np.cos(lon_base),
         np.sin(depth_base), np.cos(depth_base),
         np.sin(vs30_base), np.cos(vs30_base)], axis=-1)
    # torch.gather with index (B, 1, emb_dim): only station 0, permute by mask.
    return output[:, 0:1, mask] + eps            # LambdaLayer adds eps


if __name__ == "__main__":
    key = jax.random.PRNGKey(0)
    k_small, k_big = jax.random.split(key)
    W, phase = build_kernel_params()

    # Small real-time-style batch; force the Pallas path so the kernel runs.
    B, S = 2, 3
    x_small = jax.random.uniform(k_small, (B, S, 4), dtype=jnp.float32)
    out_small = jax.block_until_ready(
        lambda_layer_forward(x_small, W, phase, eps=EPS_DEFAULT, min_pallas_batch=0))
    ref_small = reference_forward(np.asarray(x_small), eps=EPS_DEFAULT)
    assert out_small.shape == (B, 1, EMB_DIM), out_small.shape
    np.testing.assert_allclose(np.asarray(out_small), ref_small, rtol=0, atol=1e-3)

    # Larger batch: exercises the multi-tile grid (>=2 steps), row padding
    # and the row trim; still the MXU + phase-add path.
    B2 = 200
    x_big = jax.random.uniform(k_big, (B2, S, 4), dtype=jnp.float32)
    out_big = jax.block_until_ready(
        lambda_layer_forward(x_big, W, phase, eps=EPS_DEFAULT))
    ref_big = reference_forward(np.asarray(x_big), eps=EPS_DEFAULT)
    assert out_big.shape == (B2, 1, EMB_DIM), out_big.shape
    np.testing.assert_allclose(np.asarray(out_big), ref_big, rtol=0, atol=1e-3)

    print("KERNEL_OK")
</pallas_src>

<mosaic_0001>
module attributes {stable_mosaic.version = 11 : i64} {
  func.func @_pos_emb_kernel(%arg0: i32, %arg1: memref<8x4xf32, #tpu.memory_space<vmem>>, %arg2: memref<4x500xf32, #tpu.memory_space<vmem>>, %arg3: memref<1x500xf32, #tpu.memory_space<vmem>>, %arg4: memref<8x500xf32, #tpu.memory_space<vmem>>) attributes {dimension_semantics = [#tpu.dimension_semantics<parallel>], iteration_bounds = array<i64: 1>, scalar_prefetch = 0 : i64, scratch_operands = 0 : i64, tpu.core_type = #tpu.core_type<tc>, window_params = [{transform_indices = @transform_0, window_bounds = array<i64: 8, 4>}, {pipeline_mode = #tpu.pipeline_mode<synchronous>, transform_indices = @transform_1, window_bounds = array<i64: 4, 500>}, {pipeline_mode = #tpu.pipeline_mode<synchronous>, transform_indices = @transform_2, window_bounds = array<i64: 1, 500>}, {transform_indices = @transform_3, window_bounds = array<i64: 8, 500>}]} {
    %c0 = arith.constant 0 : index
    %c0_0 = arith.constant 0 : index
    %0 = vector.load %arg1[%c0, %c0_0] : memref<8x4xf32, #tpu.memory_space<vmem>>, vector<8x4xf32>
    %c0_1 = arith.constant 0 : index
    %c0_2 = arith.constant 0 : index
    %1 = vector.load %arg2[%c0_1, %c0_2] : memref<4x500xf32, #tpu.memory_space<vmem>>, vector<4x500xf32>
    %cst = arith.constant dense<0.000000e+00> : vector<8x500xf32>
    %2 = tpu.matmul %0, %1, %cst {dimension_numbers = #tpu.dot_dimension_numbers<[1], [0], [0], [1], [0, 0, 1, 1], [], []>, precision = #tpu.contract_precision<fp32>} : vector<8x4xf32>, vector<4x500xf32>, vector<8x500xf32> -> vector<8x500xf32>
    %c0_3 = arith.constant 0 : index
    %c0_4 = arith.constant 0 : index
    %3 = vector.load %arg3[%c0_3, %c0_4] : memref<1x500xf32, #tpu.memory_space<vmem>>, vector<1x500xf32>
    %4 = vector.broadcast %3 : vector<1x500xf32> to vector<8x500xf32>
    %5 = arith.addf %2, %4 : vector<8x500xf32>
    %6 = math.sin %5 : vector<8x500xf32>
    %cst_5 = arith.constant 9.99999974E-5 : f32
    %7 = vector.broadcast %cst_5 : f32 to vector<8x500xf32>
    %8 = arith.addf %6, %7 : vector<8x500xf32>
    %c0_6 = arith.constant 0 : index
    %c0_7 = arith.constant 0 : index
    %9 = vector.load %arg4[%c0_6, %c0_7] : memref<8x500xf32, #tpu.memory_space<vmem>>, vector<8x500xf32>
    tpu.vector_store %arg4[%c0_6, %c0_7], %8 {strides = array<i32>} : memref<8x500xf32, #tpu.memory_space<vmem>>, vector<8x500xf32>,
    return
  }
  func.func @transform_0(%arg0: i32) -> (i32, i32) {
    %c0_i32 = arith.constant 0 : i32
    %c0_i32_0 = arith.constant 0 : i32
    return %arg0, %c0_i32 : i32, i32
  }
  func.func @transform_1(%arg0: i32) -> (i32, i32) {
    %c0_i32 = arith.constant 0 : i32
    %c0_i32_0 = arith.constant 0 : i32
    %c0_i32_1 = arith.constant 0 : i32
    return %c0_i32, %c0_i32_0 : i32, i32
  }
  func.func @transform_2(%arg0: i32) -> (i32, i32) {
    %c0_i32 = arith.constant 0 : i32
    %c0_i32_0 = arith.constant 0 : i32
    %c0_i32_1 = arith.constant 0 : i32
    return %c0_i32, %c0_i32_0 : i32, i32
  }
  func.func @transform_3(%arg0: i32) -> (i32, i32) {
    %c0_i32 = arith.constant 0 : i32
    %c0_i32_0 = arith.constant 0 : i32
    return %arg0, %c0_i32 : i32, i32
  }
}

</mosaic_0001>

<bundles_post_ra>
// kernel: tpu_custom_call.1
= control target key start
LH: loop header
LB: loop body
LE: loop exit
PB: predicated region body
PF: predicated region fallthrough
CT: control target
= control target key end

     0   :  { %8 = vsyncpa [#allocation3], 0  ;;  %s1883_s0 = inlined_call_operand.vmem [shape: f32[8,4], index: 0, kind: input, shape index: {}]   ;;  %s1884_s1 = inlined_call_operand.hbm [shape: f32[4,500], index: 1, kind: input, shape index: {}]   ;;  %s1885_s2 = inlined_call_operand.vmem [shape: f32[1,500], index: 2, kind: input, shape index: {}]   ;;  %s1886_s3 = inlined_call_operand.hbm [shape: f32[8,500], index: 3, kind: output, shape index: {}]  }
   0x1   :  { %9 = vsyncpa [#allocation4], 0  ;;  %s1542_s12 = smov [#allocation2]  }
   0x2   :  { %s18_s13 = sshll.u32 %s1542_s12, 4  ;;  %s19_s13 = int_to_ptr.vmem [resolvable:$true] %s18_s13 }
   0x3   :  { %s1506_s14 = scalar_lea.vmem %s19_s13, 256  ;;  %p1511_p1 = scmp.lt.s32.totalorder %s19_s13, %s19_s13 }
   0x4   :  { %p1507_p0 = scmp.ne.s32.totalorder %s19_s13, %s1506_s14  ;;  %p1512_p2 = scmp.lt.s32.totalorder %s1506_s14, %s1506_s14 }
   0x6   :  { %p1513_p3 = por %p1512_p2, %p1511_p1 }
   0x8   :  { %p1514_p4 = pnand %p1513_p3, %p1507_p0 }
   0xa   :  { %1517 = shalt.err (!%p1514_p4)
}
   0xb   :  { %21 = dma.hbm_to_vmem [thread:$0]  %s1884_s1, 256, %s19_s13, [#allocation3]  }
   0xc   :  { %1538 = dma.done.wait [#allocation3], 256  }
   0xd   :  { %1539 = vsyncadd [#allocation3], 4294967040  ;;  %v1543_v0 = vmov 0.0   ;;  %vm60_vm0 = vcmask 1043456   ;;  %vm56_vm1 = vcmask 31744   ;;  %v28_v1 = vld [vmem:[#allocation2] sm:$0xff]  ;;  %v32_v36 = vlaneseq }
   0xe   :  { %135 = vmatprep.mubr.f32.mxu0 %v1543_v0  ;;  %221 = vmatprep.mubr.f32.mxu1 %v1543_v0  ;;  %v27_v2 = vld [vmem:[%s1883_s0] sm:$0xff]  ;;  %v29_v3 = vld [vmem:[#allocation2 + $0x8] sm:$0xff]  ;;  %v54_v4 = vcombine.high %v28_v1, %v28_v1  ;;  %v61_v5 = vsel %vm60_vm0, %v28_v1, 0 }
   0xf   :  { %v58_v6 = vsel %vm56_vm1, %v27_v2, 0  ;;  %v55_v7 = vcombine.high %v29_v3, %v29_v3  ;;  %v101_v8 = vand.u32 4294901760, %v61_v5  ;;  %v65_v10 = vsel %vm60_vm0, %v29_v3, 0  ;;  %v30_v39 = vld [vmem:[%s1885_s2] sm:$0xf]  ;;  %s1550_s2 = smov [#allocation5]  }
  0x10   :  { %v1579_v9 = vand.u32 4294901760, %v58_v6  ;;  %v63_v11 = vsel %vm60_vm0, %v54_v4, 0  ;;  %v566_v17 = vand.u32 4294901760, %v65_v10  ;;  %v33_v37 = vshrl.u32 %v32_v36, 7  ;;  %s1430_s19 = sshll.u32 %s1550_s2, 4  ;;  %s1431_s19 = int_to_ptr.vmem [resolvable:$true] %s1430_s19 }
  0x11   :  { %v67_v12 = vsel %vm60_vm0, %v55_v7, 0  ;;  %v99_v13 = vand.u32 4294901760, %v63_v11  ;;  %v184_v15 = vsub.f32 %v61_v5, %v101_v8  ;;  %s1518_s20 = scalar_lea.vmem %s1431_s19, 512  ;;  %p1523_p6 = scmp.lt.s32.totalorder %s1431_s19, %s1431_s19 }
  0x12   :  { %v137_v14 = vsub.f32 %v58_v6, %v1579_v9  ;;  %v564_v16 = vand.u32 4294901760, %v67_v12  ;;  %v649_v25 = vsub.f32 %v65_v10, %v566_v17  ;;  %v34_v38 = vsub.s32 0, %v33_v37  ;;  %p1519_p5 = scmp.ne.s32.totalorder %s1431_s19, %s1518_s20  ;;  %p1524_p7 = scmp.lt.s32.totalorder %s1518_s20, %s1518_s20 }
  0x13   :  { %100 = vmatprep.subr.mxu0 %v99_v13  ;;  %v178_v19 = vsub.f32 %v63_v11, %v99_v13  ;;  %v185_v20 = vand.u32 4294901760, %v184_v15  ;;  %v38_v41 = vsub.s32 1, %v33_v37  ;;  %v42_v51 = vsub.s32 2, %v33_v37 }
  0x14   :  { %v138_v18 = vand.u32 4294901760, %v137_v14  ;;  %102 = vmatpush1.msra.mxu0 %v101_v8  ;;  %v643_v21 = vsub.f32 %v67_v12, %v564_v16  ;;  %v650_v31 = vand.u32 4294901760, %v649_v25  ;;  %v35_v40 = vrot.slane %v30_v39, %v34_v38  ;;  %p1525_p8 = por %p1524_p7, %p1523_p6 }
  0x15   :  { %v179_v23 = vand.u32 4294901760, %v178_v19  ;;  %261 = vmatprep.subr.mxu0 %v178_v19  ;;  %v186_v24 = vsub.f32 %v184_v15, %v185_v20  ;;  %v39_v44 = vrot.slane %v30_v39, %v38_v41  ;;  %v46_v59 = vsub.s32 3, %v33_v37 }
  0x16   :  { %v139_v22 = vsub.f32 %v137_v14, %v138_v18  ;;  %v644_v29 = vand.u32 4294901760, %v643_v21  ;;  %v651_v33 = vsub.f32 %v649_v25, %v650_v31  ;;  %v43_v61 = vrot.slane %v30_v39, %v42_v51  ;;  %p1526_p9 = pnand %p1525_p8, %p1519_p5 }
  0x17   :  { %v180_v27 = vsub.f32 %v178_v19, %v179_v23  ;;  %v187_v28 = vand.u32 4294901760, %v186_v24  ;;  %v47_v5 = vrot.slane %v30_v39, %v46_v59  ;;  %v1547_v51 = vmov 2102212464  }
  0x18   :  { %v140_v26 = vand.u32 4294901760, %v139_v22  ;;  %v645_v32 = vsub.f32 %v643_v21, %v644_v29  ;;  %v652_v35 = vand.u32 4294901760, %v651_v33 }
  0x19   :  { %v181_v30 = vand.u32 4294901760, %v180_v27 }
  0x1a   :  { %141 = vmatmul.mubr.f32.vlgmr.msra.gmra.mxu0 %v140_v26  ;;  %v646_v34 = vand.u32 4294901760, %v645_v32 }
  0x1b   :  { %264 = vmatpush1.msra.mxu0 %v184_v15  ;;  %297 = vmatprep.mubr.f32.mxu0 %v1543_v0 }
  0x1c   :  { %182 = vmatprep.subr.mxu1 %v181_v30  ;;  %415 = vmatprep.subr.mxu0 %v179_v23 }
  0x1d   :  { %188 = vmatpush1.msra.mxu1 %v187_v28 }
  0x1e   :  { %223 = vmatmul.mubr.f32.vlgmr.msra.gmra.mxu1 %v1579_v9  ;;  %337 = vmatprep.subr.mxu1 %v99_v13 }
  0x1f   :  { %300 = vmatmul.mubr.f32.vlgmr.msra.gmra.mxu0 %v137_v14  ;;  %339 = vmatpush1.msra.mxu1 %v101_v8 }
  0x20   :  { %372 = vmatprep.mubr.f32.mxu1 %v1543_v0  ;;  %419 = vmatpush1.msra.mxu0 %v185_v20 }
  0x21   :  { %452 = vmatprep.mubr.f32.mxu0 %v1543_v0  ;;  %491 = vmatprep.subr.mxu1 %v99_v13 }
  0x22   :  { %376 = vmatmul.mubr.f32.vlgmr.msra.gmra.mxu1 %v138_v18  ;;  %565 = vmatprep.subr.mxu0 %v564_v16 }
  0x23   :  { %454 = vmatmul.mubr.f32.vlgmr.msra.gmra.mxu0 %v1579_v9  ;;  %493 = vmatpush1.msra.mxu1 %v101_v8 }
  0x24   :  { %526 = vmatprep.mubr.f32.mxu1 %v1543_v0  ;;  %567 = vmatpush1.msra.mxu0 %v566_v17 }
  0x25   :  { %600 = vmatprep.mubr.f32.mxu0 %v1543_v0  ;;  %647 = vmatprep.subr.mxu1 %v646_v34 }
  0x26   :  { %528 = vmatmul.mubr.f32.vlgmr.msra.gmra.mxu1 %v1579_v9  ;;  %726 = vmatprep.subr.mxu0 %v643_v21 }
  0x27   :  { %606 = vmatmul.mubr.f32.vlgmr.msra.gmra.mxu0 %v140_v26  ;;  %653 = vmatpush1.msra.mxu1 %v652_v35 }
  0x28   :  { %686 = vmatprep.mubr.f32.mxu1 %v1543_v0  ;;  %729 = vmatpush1.msra.mxu0 %v649_v25 }
  0x29   :  { %762 = vmatprep.mubr.f32.mxu0 %v1543_v0  ;;  %802 = vmatprep.subr.mxu1 %v564_v16 }
  0x2a   :  { %688 = vmatmul.mubr.f32.vlgmr.msra.gmra.mxu1 %v1579_v9  ;;  %880 = vmatprep.subr.mxu0 %v644_v29 }
  0x2b   :  { %765 = vmatmul.mubr.f32.vlgmr.msra.gmra.mxu0 %v137_v14  ;;  %804 = vmatpush1.msra.mxu1 %v566_v17 }
  0x2c   :  { %837 = vmatprep.mubr.f32.mxu1 %v1543_v0  ;;  %884 = vmatpush1.msra.mxu0 %v650_v31 }
  0x2d   :  { %917 = vmatprep.mubr.f32.mxu0 %v1543_v0  ;;  %956 = vmatprep.subr.mxu1 %v564_v16 }
  0x2e   :  { %841 = vmatmul.mubr.f32.vlgmr.msra.gmra.mxu1 %v138_v18 }
  0x2f   :  { %919 = vmatmul.mubr.f32.vlgmr.msra.gmra.mxu0 %v1579_v9  ;;  %958 = vmatpush1.msra.mxu1 %v566_v17 }
  0x30   :  { %991 = vmatprep.mubr.f32.mxu1 %v1543_v0 }
  0x32   :  { %993 = vmatmul.mubr.f32.vlgmr.msra.gmra.mxu1 %v1579_v9 }
  0xda   :  { %v142_v42 = vpop.f32.mrf.mxu0 }
  0xdb   :  { %v143_v43 = vadd.f32 %v142_v42, %v35_v40 }
  0xdc   :  { %v144_v45 = vpop.f32.mrf.mxu0 }
  0xdd   :  { %v145_v47 = vadd.f32 %v144_v45, %v39_v44  ;;  %v1544_v44 = vmov 683565275  }
  0xde   :  { %v224_v46 = vpop.f32.mrf.mxu1 }
  0xdf   :  { %v225_v48 = vadd.f32 %v224_v46, %v143_v43  ;;  %v301_v49 = vpop.f32.mrf.mxu0 }
  0xe0   :  { %v226_v50 = vpop.f32.mrf.mxu1 }
  0xe1   :  { %v302_v52 = vadd.f32 %v301_v49, %v225_v48  ;;  %v227_v53 = vadd.f32 %v226_v50, %v145_v47  ;;  %v303_v54 = vpop.f32.mrf.mxu0  ;;  %v1545_v47 = vmov 2475754826   ;;  %v1546_v49 = vmov 2131351028  }
  0xe2   :  { %v377_v55 = vpop.f32.mrf.mxu1 }
  0xe3   :  { %v304_v56 = vadd.f32 %v303_v54, %v227_v53  ;;  %v378_v57 = vadd.f32 %v377_v55, %v302_v52  ;;  %v455_v58 = vpop.f32.mrf.mxu0  ;;  %v1548_v53 = vmov 920167782  }
  0xe4   :  { %v379_v60 = vpop.f32.mrf.mxu1 }
  0xe5   :  { %v456_v62 = vadd.f32 %v455_v58, %v378_v57  ;;  %v380_v63 = vadd.f32 %v379_v60, %v304_v56  ;;  %v457_v0 = vpop.f32.mrf.mxu0  ;;  %v1549_v60 = vmov 1326507024  }
  0xe6   :  { %v529_v1 = vpop.f32.mrf.mxu1 }
  0xe7   :  { %v458_v2 = vadd.f32 %v457_v0, %v380_v63  ;;  %v1601_v3 = vadd.f32 %v529_v1, %v456_v62  ;;  %v607_v4 = vpop.f32.mrf.mxu0 }
  0xe8   :  { %v608_v6 = vadd.f32 %v607_v4, %v43_v61  ;;  %v531_v7 = vpop.f32.mrf.mxu1 }
  0xe9   :  { %v999_v8 = vand.u32 2147483647, %v1601_v3  ;;  %v1002_v9 = vand.u32 2139095040, %v1601_v3  ;;  %v1605_v10 = vadd.f32 %v531_v7, %v458_v2  ;;  %v609_v11 = vpop.f32.mrf.mxu0  ;;  %vm1001_vm14 = vcmp.lt.s32.totalorder %v1601_v3, 0 }
  0xea   :  { %v689_v12 = vpop.f32.mrf.mxu1  ;;  %v610_v14 = vadd.f32 %v609_v11, %v47_v5 }
  0xeb   :  { %v1003_v13 = vshrl.u32 %v1002_v9, 23  ;;  %v766_v15 = vpop.f32.mrf.mxu0  ;;  %v1006_v16 = vand.u32 8388607, %v999_v8  ;;  %v1103_v17 = vand.u32 2147483647, %v1605_v10  ;;  %v1106_v18 = vand.u32 2139095040, %v1605_v10 }
  0xec   :  { %v690_v19 = vadd.f32 %v689_v12, %v608_v6  ;;  %v691_v20 = vpop.f32.mrf.mxu1  ;;  %vm1692_vm15 = vcmp.le.f32.partialorder %v999_v8, 0.7853982 }
  0xed   :  { %v1439_v21 = vadd.s32 4294967169, %v1003_v13  ;;  %v692_v22 = vadd.f32 %v691_v20, %v610_v14  ;;  %v1107_v23 = vshrl.u32 %v1106_v18, 23  ;;  %v1110_v24 = vand.u32 8388607, %v1103_v17  ;;  %v768_v28 = vpop.f32.mrf.mxu0 }
  0xee   :  { %v767_v25 = vadd.f32 %v766_v15, %v690_v19  ;;  %v842_v26 = vpop.f32.mrf.mxu1  ;;  %v1007_v29 = vor.u32 8388608, %v1006_v16 }
  0xef   :  { %v1009_v27 = vadd.s32 1, %v1439_v21  ;;  %v1443_v30 = vadd.s32 4294967169, %v1107_v23  ;;  %v1111_v31 = vor.u32 8388608, %v1110_v24  ;;  %v769_v32 = vadd.f32 %v768_v28, %v692_v22  ;;  %v920_v41 = vpop.f32.mrf.mxu0 }
  0xf0   :  { %v843_v33 = vadd.f32 %v842_v26, %v767_v25  ;;  %v844_v34 = vpop.f32.mrf.mxu1  ;;  %v1613_v39 = vshll.u32 %v1007_v29, 8 }
  0xf1   :  { %vm1010_vm2 = vcmp.gt.s32.totalorder %v1009_v27, 0  ;;  %v1113_v36 = vadd.s32 1, %v1443_v30  ;;  %v1615_v40 = vshll.u32 %v1111_v31, 8  ;;  %v1617_v42 = vadd.f32 %v844_v34, %v769_v32 }
  0xf2   :  { %v1011_v35 = vsel %vm1010_vm2, %v1009_v27, 0  ;;  %v921_v46 = vadd.f32 %v920_v41, %v843_v33  ;;  %v994_v6 = vpop.f32.mrf.mxu1 }
  0xf3   :  { %v1012_v37 = vshrl.u32 %v1011_v35, 5  ;;  %v1013_v38 = vand.u32 31, %v1011_v35  ;;  %vm1114_vm3 = vcmp.gt.s32.totalorder %v1113_v36, 0 }
  0xf4   :  { %v1115_v1 = vsel %vm1114_vm3, %v1113_v36, 0  ;;  %v1637_v20 = vadd.f32 %v994_v6, %v921_v46 }
  0xf5   :  { %v1014_v43 = vsub.s32 32, %v1013_v38  ;;  %v1016_v45 = vshll.u32 %v1544_v44, %v1013_v38  ;;  %v1019_v48 = vshll.u32 %v1545_v47, %v1013_v38  ;;  %v1022_v50 = vshll.u32 %v1546_v49, %v1013_v38 }
  0xf6   :  { %v1025_v52 = vshll.u32 %v1547_v51, %v1013_v38  ;;  %v1028_v54 = vshll.u32 %v1548_v53, %v1013_v38  ;;  %vm1031_vm4 = vcmp.lt.s32.totalorder %v1012_v37, 1  ;;  %vm1033_vm5 = vcmp.lt.s32.totalorder %v1012_v37, 3 }
  0xf7   :  { %v1017_v55 = vshrl.u32 %v1545_v47, %v1014_v43  ;;  %v1020_v56 = vshrl.u32 %v1546_v49, %v1014_v43  ;;  %v1023_v57 = vshrl.u32 %v1547_v51, %v1014_v43  ;;  %v1015_v58 = vshrl.u32 %v1544_v44, %v1014_v43 }
  0xf8   :  { %v1026_v59 = vshrl.u32 %v1548_v53, %v1014_v43  ;;  %v1029_v61 = vshrl.u32 %v1549_v60, %v1014_v43  ;;  %vm1034_vm6 = vcmp.lt.s32.totalorder %v1012_v37, 4  ;;  %v1117_v5 = vand.u32 31, %v1115_v1 }
  0xf9   :  { %v1018_v62 = vor.u32 %v1017_v55, %v1016_v45  ;;  %v1021_v63 = vor.u32 %v1020_v56, %v1019_v48  ;;  %v1024_v0 = vor.u32 %v1023_v57, %v1022_v50  ;;  %vm1032_vm7 = vcmp.lt.s32.totalorder %v1012_v37, 2 }
  0xfa   :  { %v1027_v2 = vor.u32 %v1026_v59, %v1025_v52  ;;  %v1030_v4 = vor.u32 %v1029_v61, %v1028_v54  ;;  %v1118_v16 = vsub.s32 32, %v1117_v5  ;;  %v1116_v24 = vshrl.u32 %v1115_v1, 5 }
  0xfb   :  { %v1035_v7 = vsel %vm1031_vm4, %v1015_v58, %v1018_v62  ;;  %v1036_v9 = vsel %vm1034_vm6, %v1024_v0, 2102212464  ;;  %v1039_v11 = vsel %vm1031_vm4, %v1018_v62, %v1021_v63  ;;  %v1043_v12 = vsel %vm1031_vm4, %v1021_v63, %v1024_v0 }
  0xfc   :  { %v1037_v13 = vsel %vm1033_vm5, %v1021_v63, %v1036_v9  ;;  %v1040_v14 = vsel %vm1034_vm6, %v1027_v2, 920167782  ;;  %v1044_v15 = vsel %vm1034_vm6, %v1030_v4, 1326507024  ;;  %v1120_v29 = vshll.u32 %v1544_v44, %v1117_v5 }
  0xfd   :  { %v1041_v18 = vsel %vm1033_vm5, %v1024_v0, %v1040_v14  ;;  %v1045_v19 = vsel %vm1033_vm5, %v1027_v2, %v1044_v15  ;;  %v1038_v21 = vsel %vm1032_vm7, %v1035_v7, %v1037_v13  ;;  %v1121_v30 = vshrl.u32 %v1545_v47, %v1118_v16 }
  0xfe   :  { %v1042_v22 = vsel %vm1032_vm7, %v1039_v11, %v1041_v18  ;;  %v1046_v23 = vsel %vm1032_vm7, %v1043_v12, %v1045_v19  ;;  %v1123_v31 = vshll.u32 %v1545_v47, %v1117_v5  ;;  %v1124_v32 = vshrl.u32 %v1546_v49, %v1118_v16 }
  0xff   :  { %v1640_v25 = vmul.u32.u64.low %v1613_v39, %v1046_v23  ;;  %v1641_v26 = vmul.u32.u64.high %v1613_v39, %v1046_v23, %v1640_v25  ;;  %v1644_v27 = vmul.u32.u64.low %v1613_v39, %v1042_v22  ;;  %v1645_v28 = vmul.u32.u64.high %v1613_v39, %v1042_v22, %v1644_v27 }
 0x100   :  { %v1126_v33 = vshll.u32 %v1546_v49, %v1117_v5  ;;  %v1127_v34 = vshrl.u32 %v1547_v51, %v1118_v16  ;;  %v1129_v35 = vshll.u32 %v1547_v51, %v1117_v5  ;;  %v1130_v36 = vshrl.u32 %v1548_v53, %v1118_v16 }
 0x101   :  { %v1122_v37 = vor.u32 %v1121_v30, %v1120_v29  ;;  %v1125_v38 = vor.u32 %v1124_v32, %v1123_v31  ;;  %v1132_v41 = vshll.u32 %v1548_v53, %v1117_v5  ;;  %v1133_v43 = vshrl.u32 %v1549_v60, %v1118_v16  ;;  %v922_v5 = vpop.f32.mrf.mxu0 }
 0x102   :  { %v1054_v45 = vmul.u32 %v1613_v39, %v1038_v21  ;;  %vm1056_vm8 = vc.u32 %v1641_v26, %v1644_v27  ;;  %v1057_v46 = vadd.s32 1, %v1645_v28  ;;  %v1128_v48 = vor.u32 %v1127_v34, %v1126_v33 }
 0x103   :  { %v1119_v50 = vshrl.u32 %v1544_v44, %v1118_v16  ;;  %v1131_v52 = vor.u32 %v1130_v36, %v1129_v35  ;;  %v1134_v54 = vor.u32 %v1133_v43, %v1132_v41  ;;  %vm1135_vm9 = vcmp.lt.s32.totalorder %v1116_v24, 1  ;;  %v996_v16 = vpop.f32.mrf.mxu1 }
 0x104   :  { %v1058_v55 = vsel %vm1056_vm8, %v1057_v46, %v1645_v28  ;;  %vm1137_vm10 = vcmp.lt.s32.totalorder %v1116_v24, 3  ;;  %vm1138_vm11 = vcmp.lt.s32.totalorder %v1116_v24, 4  ;;  %v1143_v56 = vsel %vm1135_vm9, %v1122_v37, %v1125_v38 }
 0x105   :  { %v1059_v57 = vadd.s32 %v1058_v55, %v1054_v45  ;;  %v1140_v58 = vsel %vm1138_vm11, %v1128_v48, 2102212464  ;;  %v1144_v59 = vsel %vm1138_vm11, %v1131_v52, 920167782  ;;  %v1147_v39 = vsel %vm1135_vm9, %v1125_v38, %v1128_v48 }
 0x106   :  { %vm1136_vm12 = vcmp.lt.s32.totalorder %v1116_v24, 2  ;;  %v1139_v61 = vsel %vm1135_vm9, %v1119_v50, %v1122_v37  ;;  %v1145_v62 = vsel %vm1137_vm10, %v1128_v48, %v1144_v59  ;;  %v1148_v63 = vsel %vm1138_vm11, %v1134_v54, 1326507024 }
 0x107   :  { %v1060_v0 = vadd.s32 536870912, %v1059_v57  ;;  %v1141_v1 = vsel %vm1137_vm10, %v1125_v38, %v1140_v58  ;;  %v1146_v2 = vsel %vm1136_vm12, %v1143_v56, %v1145_v62  ;;  %v1149_v4 = vsel %vm1137_vm10, %v1131_v52, %v1148_v63 }
 0x108   :  { %v1150_v6 = vsel %vm1136_vm12, %v1147_v39, %v1149_v4  ;;  %v1667_v7 = vmul.u32.u64.low %v1615_v40, %v1146_v2  ;;  %v1668_v9 = vmul.u32.u64.high %v1615_v40, %v1146_v2, %v1667_v7  ;;  %v923_v11 = vadd.f32 %v922_v5, %v1617_v42 }
 0x109   :  { %v1061_v12 = vshrl.u32 %v1060_v0, 30  ;;  %v1672_v13 = vmul.u32.u64.low %v1615_v40, %v1150_v6  ;;  %v1673_v14 = vmul.u32.u64.high %v1615_v40, %v1150_v6, %v1672_v13  ;;  %v1207_v15 = vand.u32 2147483647, %v1637_v20 }
 0x10a   :  { %v1142_v18 = vsel %vm1136_vm12, %v1139_v61, %v1141_v1  ;;  %v1210_v19 = vand.u32 2139095040, %v1637_v20  ;;  %v1161_v23 = vadd.s32 1, %v1668_v9  ;;  %v1679_v28 = vadd.f32 %v996_v16, %v923_v11 }
 0x10b   :  { %v1062_v21 = vshll.u32 %v1061_v12, 30  ;;  %v1085_v22 = vsub.s32 4, %v1061_v12  ;;  %v1158_v29 = vmul.u32 %v1615_v40, %v1142_v18  ;;  %vm1160_vm13 = vc.u32 %v1673_v14, %v1667_v7 }
 0x10c   :  { %v1211_v25 = vshrl.u32 %v1210_v19, 23  ;;  %v1214_v30 = vand.u32 8388607, %v1207_v15  ;;  %v1162_v24 = vsel %vm1160_vm13, %v1161_v23, %v1668_v9  ;;  %v1314_v36 = vand.u32 2139095040, %v1679_v28 }
 0x10d   :  { %v1063_v42 = vsub.s32 %v1059_v57, %v1062_v21  ;;  %v1086_v33 = vsel %vm1001_vm14, %v1085_v22, %v1061_v12  ;;  %v1163_v34 = vadd.s32 %v1162_v24, %v1158_v29  ;;  %v1311_v45 = vand.u32 2147483647, %v1679_v28 }
 0x10e   :  { %v1447_v31 = vadd.s32 4294967169, %v1211_v25  ;;  %v1215_v41 = vor.u32 8388608, %v1214_v30  ;;  %v1088_v43 = vsel %vm1692_vm15, 0, %v1086_v33  ;;  %v1315_v52 = vshrl.u32 %v1314_v36, 23 }
 0x10f   :  { %v1065_v32 = vsub.s32 0, %v1063_v42  ;;  %v1164_v38 = vadd.s32 536870912, %v1163_v34  ;;  %v1055_v8 = vadd.s32 %v1644_v27, %v1641_v26  ;;  %v1704_v56 = vadd.s32 %v1667_v7, %v1673_v14 }
 0x110   :  { %v1217_v35 = vadd.s32 1, %v1447_v31  ;;  %v1707_v58 = vshll.u32 %v1215_v41, 8  ;;  %v1709_v59 = vadd.s32 3, %v1088_v43  ;;  %v1715_v62 = vand.u32 8388607, %v1311_v45 }
 0x111   :  { %v1440_v37 = vmin.u32 %v1065_v32, %v1063_v42  ;;  %v1699_v48 = vshrl.u32 %v1164_v38, 30  ;;  %v1451_v63 = vadd.s32 4294967169, %v1315_v52  ;;  %vm1105_vm8 = vcmp.lt.s32.totalorder %v1605_v10, 0 }
 0x112   :  { %vm1218_vm0 = vcmp.gt.s32.totalorder %v1217_v35, 0  ;;  %vm1783_vm9 = vcmp.le.f32.partialorder %v1103_v17, 0.7853982 }
 0x113   :  { %v1067_v46 = vclz %v1440_v37  ;;  %v1219_v50 = vsel %vm1218_vm0, %v1217_v35, 0  ;;  %v1166_v57 = vshll.u32 %v1699_v48, 30 }
 0x114   :  { %v1221_v54 = vand.u32 31, %v1219_v50  ;;  %v1711_v39 = vshrl.u32 %v1219_v50, 5 }
 0x115   :  { %v1441_v55 = vadd.s32 4294967294, %v1067_v46  ;;  %v1717_v26 = vsub.s32 %v1163_v34, %v1166_v57 }
 0x116   :  { %v1222_v61 = vsub.s32 32, %v1221_v54  ;;  %v1224_v27 = vshll.u32 %v1544_v44, %v1221_v54  ;;  %v1227_v2 = vshll.u32 %v1545_v47, %v1221_v54  ;;  %v1230_v4 = vshll.u32 %v1546_v49, %v1221_v54 }
 0x117   :  { %vm1442_vm1 = vcmp.lt.s32.totalorder %v1441_v55, 0  ;;  %v1169_v7 = vsub.s32 0, %v1717_v26  ;;  %v1233_v9 = vshll.u32 %v1547_v51, %v1221_v54  ;;  %v1236_v29 = vshll.u32 %v1548_v53, %v1221_v54 }
 0x118   :  { %v1070_v0 = vsel %vm1442_vm1, 0, %v1441_v55  ;;  %v1225_v1 = vshrl.u32 %v1545_v47, %v1222_v61  ;;  %v1223_v12 = vshrl.u32 %v1544_v44, %v1222_v61  ;;  %v1228_v13 = vshrl.u32 %v1546_v49, %v1222_v61 }
 0x119   :  { %v1071_v5 = vsub.s32 32, %v1070_v0  ;;  %v1075_v6 = vsub.s32 4294967266, %v1070_v0  ;;  %v1072_v11 = vshll.u32 %v1063_v42, %v1070_v0  ;;  %v1231_v14 = vshrl.u32 %v1547_v51, %v1222_v61 }
 0x11a   :  { %v1444_v19 = vmin.u32 %v1169_v7, %v1717_v26  ;;  %v1234_v21 = vshrl.u32 %v1548_v53, %v1222_v61  ;;  %v1226_v22 = vor.u32 %v1225_v1, %v1224_v27  ;;  %v1229_v23 = vor.u32 %v1228_v13, %v1227_v2 }
 0x11b   :  { %v1073_v16 = vshrl.u32 %v1055_v8, %v1071_v5  ;;  %v1076_v18 = vadd.s32 127, %v1075_v6  ;;  %v1232_v25 = vor.u32 %v1231_v14, %v1230_v4  ;;  %v1237_v32 = vshrl.u32 %v1549_v60, %v1222_v61 }
 0x11c   :  { %v1171_v42 = vclz %v1444_v19  ;;  %v1235_v31 = vor.u32 %v1234_v21, %v1233_v9  ;;  %vm1239_vm2 = vcmp.lt.s32.totalorder %v1711_v39, 1  ;;  %vm1240_vm3 = vcmp.lt.s32.totalorder %v1711_v39, 2 }
 0x11d   :  { %v1074_v30 = vor.u32 %v1073_v16, %v1072_v11  ;;  %v1077_v24 = vshll.u32 %v1076_v18, 23  ;;  %vm1241_vm4 = vcmp.lt.s32.totalorder %v1711_v39, 3  ;;  %vm1242_vm5 = vcmp.lt.s32.totalorder %v1711_v39, 4 }
 0x11e   :  { %v1445_v35 = vadd.s32 4294967294, %v1171_v42  ;;  %v1238_v36 = vor.u32 %v1237_v32, %v1236_v29  ;;  %v1243_v37 = vsel %vm1239_vm2, %v1223_v12, %v1226_v22  ;;  %v1244_v38 = vsel %vm1242_vm5, %v1232_v25, 2102212464 }
 0x11f   :  { %v1078_v33 = vor.u32 4788187, %v1077_v24  ;;  %v1081_v34 = vcvt.s32.f32 %v1074_v30  ;;  %v1247_v41 = vsel %vm1239_vm2, %v1226_v22, %v1229_v23  ;;  %v1245_v46 = vsel %vm1241_vm4, %v1229_v23, %v1244_v38 }
 0x120   :  { %vm1446_vm6 = vcmp.lt.s32.totalorder %v1445_v35, 0  ;;  %v1248_v50 = vsel %vm1242_vm5, %v1235_v31, 920167782  ;;  %v1246_v8 = vsel %vm1240_vm3, %v1243_v37, %v1245_v46  ;;  %v1319_v55 = vor.u32 8388608, %v1715_v62 }
 0x121   :  { %v1079_v43 = vand.u32 2147483647, %v1078_v33  ;;  %v1174_v52 = vsel %vm1446_vm6, 0, %v1445_v35  ;;  %v1249_v54 = vsel %vm1241_vm4, %v1232_v25, %v1248_v50  ;;  %v1251_v0 = vsel %vm1239_vm2, %v1229_v23, %v1232_v25 }
 0x122   :  { %v1175_v61 = vsub.s32 32, %v1174_v52  ;;  %v1179_v27 = vsub.s32 4294967266, %v1174_v52  ;;  %v1176_v1 = vshll.u32 %v1717_v26, %v1174_v52  ;;  %v1250_v2 = vsel %vm1240_vm3, %v1247_v41, %v1249_v54 }
 0x123   :  { %v1082_v57 = vmul.f32 %v1081_v34, %v1079_v43  ;;  %v1252_v4 = vsel %vm1242_vm5, %v1238_v36, 1326507024  ;;  %v1321_v5 = vadd.s32 1, %v1451_v63  ;;  %v1774_v18 = vand.u32 3, %v1709_v59 }
 0x124   :  { %v1177_v7 = vshrl.u32 %v1704_v56, %v1175_v61  ;;  %v1180_v9 = vadd.s32 127, %v1179_v27  ;;  %v1253_v62 = vsel %vm1241_vm4, %v1235_v31, %v1252_v4  ;;  %v1787_v40 = vshll.u32 %v1319_v55, 8 }
 0x125   :  { %v1083_v6 = vxor.u32 2147483648, %v1082_v57  ;;  %v1254_v11 = vsel %vm1240_vm3, %v1251_v0, %v1253_v62  ;;  %v1764_v12 = vmul.u32.u64.low %v1707_v58, %v1250_v2  ;;  %v1765_v26 = vmul.u32.u64.high %v1707_v58, %v1250_v2, %v1764_v12 }
 0x126   :  { %vm1322_vm7 = vcmp.gt.s32.totalorder %v1321_v5, 0  ;;  %v1178_v63 = vor.u32 %v1177_v7, %v1176_v1  ;;  %v1181_v14 = vshll.u32 %v1180_v9, 23  ;;  %v1189_v59 = vsub.s32 4, %v1699_v48 }
 0x127   :  { %v1084_v13 = vsel %vm1001_vm14, %v1083_v6, %v1082_v57  ;;  %v1323_v16 = vsel %vm1322_vm7, %v1321_v5, 0  ;;  %v1778_v39 = vmul.u32.u64.low %v1707_v58, %v1254_v11  ;;  %v1779_v19 = vmul.u32.u64.high %v1707_v58, %v1254_v11, %v1778_v39 }
 0x128   :  { %v1087_v56 = vsel %vm1692_vm15, %v1601_v3, %v1084_v13  ;;  %v1182_v22 = vor.u32 4788187, %v1181_v14  ;;  %v1325_v23 = vand.u32 31, %v1323_v16  ;;  %v1262_v25 = vmul.u32 %v1707_v58, %v1246_v8 }
 0x129   :  { %1482 = vcosq.f32 %v1087_v56  ;;  %v1265_v29 = vadd.s32 1, %v1765_v26  ;;  %v1185_v24 = vcvt.s32.f32 %v1178_v63  ;;  %v1324_v42 = vshrl.u32 %v1323_v16, 5 }
 0x12a   :  { %1484 = vsinq.f32 %v1087_v56  ;;  %v1183_v30 = vand.u32 2147483647, %v1182_v22  ;;  %v1326_v31 = vsub.s32 32, %v1325_v23  ;;  %vm1264_vm10 = vc.u32 %v1779_v19, %v1764_v12 }
 0x12b   :  { %v1328_v17 = vshll.u32 %v1544_v44, %v1325_v23  ;;  %v1331_v32 = vshll.u32 %v1545_v47, %v1325_v23  ;;  %v1334_v33 = vshll.u32 %v1546_v49, %v1325_v23  ;;  %v1266_v35 = vsel %vm1264_vm10, %v1265_v29, %v1765_v26 }
 0x12c   :  { %v1186_v34 = vmul.f32 %v1185_v24, %v1183_v30  ;;  %v1329_v58 = vshrl.u32 %v1545_v47, %v1326_v31  ;;  %v1337_v36 = vshll.u32 %v1547_v51, %v1325_v23  ;;  %v1267_v37 = vadd.s32 %v1266_v35, %v1262_v25 }
 0x12d   :  { %v1332_v38 = vshrl.u32 %v1546_v49, %v1326_v31  ;;  %v1335_v41 = vshrl.u32 %v1547_v51, %v1326_v31  ;;  %v1338_v43 = vshrl.u32 %v1548_v53, %v1326_v31  ;;  %v1340_v52 = vshll.u32 %v1548_v53, %v1325_v23 }
 0x12e   :  { %v1187_v46 = vxor.u32 2147483648, %v1186_v34  ;;  %v1330_v50 = vor.u32 %v1329_v58, %v1328_v17  ;;  %v1341_v8 = vshrl.u32 %v1549_v60, %v1326_v31  ;;  %v1268_v54 = vadd.s32 536870912, %v1267_v37 }
 0x12f   :  { %v1333_v55 = vor.u32 %v1332_v38, %v1331_v32  ;;  %v1336_v57 = vor.u32 %v1335_v41, %v1334_v33  ;;  %v1339_v61 = vor.u32 %v1338_v43, %v1337_v36  ;;  %v1190_v49 = vsel %vm1105_vm8, %v1189_v59, %v1699_v48 }
 0x130   :  { %v1188_v47 = vsel %vm1105_vm8, %v1187_v46, %v1186_v34  ;;  %v1342_v51 = vor.u32 %v1341_v8, %v1340_v52  ;;  %vm1343_vm11 = vcmp.lt.s32.totalorder %v1324_v42, 1  ;;  %v1813_v53 = vshrl.u32 %v1268_v54, 30 }
 0x131   :  { %v1191_v27 = vsel %vm1783_vm9, %v1605_v10, %v1188_v47  ;;  %v1327_v60 = vshrl.u32 %v1544_v44, %v1326_v31  ;;  %vm1346_vm12 = vcmp.lt.s32.totalorder %v1324_v42, 4  ;;  %v1351_v1 = vsel %vm1343_vm11, %v1330_v50, %v1333_v55 }
 0x132   :  { %1486 = vcosq.f32 %v1191_v27  ;;  %v1348_v0 = vsel %vm1346_vm12, %v1336_v57, 2102212464  ;;  %v1352_v2 = vsel %vm1346_vm12, %v1339_v61, 920167782  ;;  %v1270_v4 = vshll.u32 %v1813_v53, 30 }
 0x133   :  { %1488 = vsinq.f32 %v1191_v27  ;;  %vm1344_vm13 = vcmp.lt.s32.totalorder %v1324_v42, 2  ;;  %vm1345_vm14 = vcmp.lt.s32.totalorder %v1324_v42, 3  ;;  %v1347_v48 = vsel %vm1343_vm11, %v1327_v60, %v1330_v50 }
 0x134   :  { %v1353_v5 = vsel %vm1345_vm14, %v1336_v57, %v1352_v2  ;;  %v1355_v6 = vsel %vm1343_vm11, %v1333_v55, %v1336_v57  ;;  %v1356_v7 = vsel %vm1346_vm12, %v1342_v51, 1326507024  ;;  %v1271_v62 = vsub.s32 %v1267_v37, %v1270_v4 }
 0x135   :  { %v1349_v11 = vsel %vm1345_vm14, %v1333_v55, %v1348_v0  ;;  %v1354_v26 = vsel %vm1344_vm13, %v1351_v1, %v1353_v5  ;;  %v1357_v44 = vsel %vm1345_vm14, %v1339_v61, %v1356_v7  ;;  %v1192_v56 = vsel %vm1783_vm9, 0, %v1190_v49 }
 0x136   :  { %v1483_v9 = vpop.eup %1482  ;;  %v1358_v63 = vsel %vm1344_vm13, %v1355_v6, %v1357_v44  ;;  %v1820_v14 = vmul.u32.u64.low %v1787_v40, %v1354_v26  ;;  %v1821_v16 = vmul.u32.u64.high %v1787_v40, %v1354_v26, %v1820_v14  ;;  %v1273_v39 = vsub.s32 0, %v1271_v62 }
 0x137   :  { %v1485_v13 = vpop.eup %1484  ;;  %v1827_v22 = vmul.u32.u64.low %v1787_v40, %v1358_v63  ;;  %v1828_v23 = vmul.u32.u64.high %v1787_v40, %v1358_v63, %v1827_v22  ;;  %v1350_v59 = vsel %vm1344_vm13, %v1347_v48, %v1349_v11  ;;  %vm1091_vm15 = vweird.f32 %v1601_v3 }
 0x138   :  { %v1096_v25 = vxor.u32 2147483648, %v1485_v13  ;;  %v1099_v29 = vxor.u32 2147483648, %v1483_v9  ;;  %v1448_v30 = vmin.u32 %v1273_v39, %v1271_v62  ;;  %vm1094_vm0 = vcmp.lt.s32.totalorder %v1774_v18, 2 }
 0x139   :  { %vm1095_vm1 = vcmp.eq.s32.totalorder %v1774_v18, 0  ;;  %vm1098_vm2 = vcmp.eq.s32.totalorder %v1774_v18, 2  ;;  %v1196_v21 = vadd.s32 3, %v1192_v56  ;;  %v1369_v24 = vadd.s32 1, %v1821_v16 }
 0x13a   :  { %v1097_v31 = vsel %vm1095_vm1, %v1483_v9, %v1096_v25  ;;  %v1100_v17 = vsel %vm1098_vm2, %v1099_v29, %v1485_v13  ;;  %v1275_v32 = vclz %v1448_v30  ;;  %v1366_v42 = vmul.u32 %v1787_v40, %v1350_v59 }
 0x13b   :  { %vm1368_vm3 = vc.u32 %v1828_v23, %v1820_v14  ;;  %v1101_v33 = vsel %vm1094_vm0, %v1097_v31, %v1100_v17  ;;  %v1197_v37 = vand.u32 3, %v1196_v21  ;;  %v1263_v50 = vadd.s32 %v1764_v12, %v1779_v19 }
 0x13c   :  { %v1370_v34 = vsel %vm1368_vm3, %v1369_v24, %v1821_v16  ;;  %v1102_v35 = vsel %vm1091_vm15, nan, %v1101_v33  ;;  %v1449_v58 = vadd.s32 4294967294, %v1275_v32  ;;  %vm1195_vm8 = vweird.f32 %v1605_v10 }
 0x13d   :  { %v1371_v36 = vadd.s32 %v1370_v34, %v1366_v42  ;;  %v1415_v18 = vadd.f32 0.0001, %v1102_v35  ;;  %vm1199_vm5 = vcmp.eq.s32.totalorder %v1197_v37, 0  ;;  %vm1202_vm6 = vcmp.eq.s32.totalorder %v1197_v37, 2 }
 0x13e   :  { %vm1450_vm4 = vcmp.lt.s32.totalorder %v1449_v58, 0  ;;  %vm1198_vm7 = vcmp.lt.s32.totalorder %v1197_v37, 2  ;;  %vm1209_vm9 = vcmp.lt.s32.totalorder %v1637_v20, 0  ;;  %v1293_v26 = vsub.s32 4, %v1813_v53 }
 0x13f   :  { %v1487_v38 = vpop.eup %1486  ;;  %v1372_v41 = vadd.s32 536870912, %v1371_v36  ;;  %1419 = vst [vmem:[#allocation5] sm:$0xff] %v1415_v18  ;;  %v1278_v46 = vsel %vm1450_vm4, 0, %v1449_v58  ;;  %vm1852_vm10 = vcmp.le.f32.partialorder %v1207_v15, 0.7853982  ;;  %v1367_v16 = vadd.s32 %v1820_v14, %v1828_v23 }
 0x140   :  { %v1489_v43 = vpop.eup %1488  ;;  %v1203_v40 = vxor.u32 2147483648, %v1487_v38  ;;  %v1279_v52 = vsub.s32 32, %v1278_v46  ;;  %v1283_v8 = vsub.s32 4294967266, %v1278_v46  ;;  %v1280_v3 = vshll.u32 %v1271_v62, %v1278_v46 }
 0x141   :  { %v1844_v54 = vshrl.u32 %v1372_v41, 30  ;;  %v1200_v55 = vxor.u32 2147483648, %v1489_v43  ;;  %v1294_v22 = vsel %vm1209_vm9, %v1293_v26, %v1813_v53  ;;  %vm1313_vm12 = vcmp.lt.s32.totalorder %v1679_v28, 0 }
 0x142   :  { %v1281_v57 = vshrl.u32 %v1263_v50, %v1279_v52  ;;  %v1284_v61 = vadd.s32 127, %v1283_v8  ;;  %v1204_v49 = vsel %vm1202_vm6, %v1203_v40, %v1489_v43  ;;  %v1296_v29 = vsel %vm1852_vm10, 0, %v1294_v22 }
 0x143   :  { %v1374_v47 = vshll.u32 %v1844_v54, 30  ;;  %v1201_v51 = vsel %vm1199_vm5, %v1487_v38, %v1200_v55  ;;  %v1300_v31 = vadd.s32 3, %v1296_v29  ;;  %v1397_v53 = vsub.s32 4, %v1844_v54 }
 0x144   :  { %v1282_v27 = vor.u32 %v1281_v57, %v1280_v3  ;;  %v1285_v60 = vshll.u32 %v1284_v61, 23  ;;  %v1205_v1 = vsel %vm1198_vm7, %v1201_v51, %v1204_v49  ;;  %vm1868_vm13 = vcmp.le.f32.partialorder %v1311_v45, 0.7853982 }
 0x145   :  { %v1375_v0 = vsub.s32 %v1371_v36, %v1374_v47  ;;  %v1206_v2 = vsel %vm1195_vm8, nan, %v1205_v1  ;;  %v1301_v33 = vand.u32 3, %v1300_v31  ;;  %v1398_v41 = vsel %vm1313_vm12, %v1397_v53, %v1844_v54 }
 0x146   :  { %v1286_v12 = vor.u32 4788187, %v1285_v60  ;;  %v1289_v48 = vcvt.s32.f32 %v1282_v27  ;;  %v1416_v6 = vadd.f32 0.0001, %v1206_v2  ;;  %vm1299_vm1 = vweird.f32 %v1637_v20 }
 0x147   :  { %v1377_v19 = vsub.s32 0, %v1375_v0  ;;  %vm1306_vm14 = vcmp.eq.s32.totalorder %v1301_v33, 2  ;;  %vm1303_vm15 = vcmp.eq.s32.totalorder %v1301_v33, 0  ;;  %vm1302_vm0 = vcmp.lt.s32.totalorder %v1301_v33, 2 }
 0x148   :  { %v1287_v4 = vand.u32 2147483647, %v1286_v12  ;;  %1420 = vst [vmem:[#allocation5 + $0x8] sm:$0xff] %v1416_v6  ;;  %v1400_v40 = vsel %vm1868_vm13, 0, %v1398_v41  ;;  %vm1403_vm5 = vweird.f32 %v1679_v28  ;;  %vm1422_vm6 = vcmask 949248  }
 0x149   :  { %v1452_v5 = vmin.u32 %v1377_v19, %v1375_v0  ;;  %v1404_v52 = vadd.s32 3, %v1400_v40 }
 0x14a   :  { %v1290_v7 = vmul.f32 %v1289_v48, %v1287_v4 }
 0x14b   :  { %v1379_v9 = vclz %v1452_v5  ;;  %v1405_v8 = vand.u32 3, %v1404_v52 }
 0x14c   :  { %v1291_v62 = vxor.u32 2147483648, %v1290_v7 }
 0x14d   :  { %v1453_v11 = vadd.s32 4294967294, %v1379_v9  ;;  %vm1410_vm2 = vcmp.eq.s32.totalorder %v1405_v8, 2  ;;  %vm1407_vm3 = vcmp.eq.s32.totalorder %v1405_v8, 0  ;;  %vm1406_vm4 = vcmp.lt.s32.totalorder %v1405_v8, 2 }
 0x14e   :  { %v1292_v10 = vsel %vm1209_vm9, %v1291_v62, %v1290_v7 }
 0x14f   :  { %vm1454_vm11 = vcmp.lt.s32.totalorder %v1453_v11, 0  ;;  %v1295_v13 = vsel %vm1852_vm10, %v1637_v20, %v1292_v10 }
 0x150   :  { %v1382_v63 = vsel %vm1454_vm11, 0, %v1453_v11  ;;  %1490 = vcosq.f32 %v1295_v13 }
 0x151   :  { %v1383_v56 = vsub.s32 32, %v1382_v63  ;;  %v1387_v39 = vsub.s32 4294967266, %v1382_v63  ;;  %1492 = vsinq.f32 %v1295_v13  ;;  %v1384_v15 = vshll.u32 %v1375_v0, %v1382_v63 }
 0x153   :  { %v1385_v59 = vshrl.u32 %v1367_v16, %v1383_v56  ;;  %v1388_v25 = vadd.s32 127, %v1387_v39 }
 0x155   :  { %v1386_v30 = vor.u32 %v1385_v59, %v1384_v15  ;;  %v1389_v21 = vshll.u32 %v1388_v25, 23 }
 0x157   :  { %v1390_v24 = vor.u32 4788187, %v1389_v21  ;;  %v1393_v32 = vcvt.s32.f32 %v1386_v30 }
 0x159   :  { %v1391_v17 = vand.u32 2147483647, %v1390_v24 }
 0x15b   :  { %v1394_v42 = vmul.f32 %v1393_v32, %v1391_v17 }
 0x15d   :  { %v1395_v14 = vxor.u32 2147483648, %v1394_v42  ;;  %v1491_v23 = vpop.eup %1490 }
 0x15e   :  { %v1493_v34 = vpop.eup %1492  ;;  %v1307_v36 = vxor.u32 2147483648, %v1491_v23 }
 0x15f   :  { %v1396_v58 = vsel %vm1313_vm12, %v1395_v14, %v1394_v42  ;;  %v1304_v37 = vxor.u32 2147483648, %v1493_v34 }
 0x160   :  { %v1399_v18 = vsel %vm1868_vm13, %v1679_v28, %v1396_v58  ;;  %v1308_v38 = vsel %vm1306_vm14, %v1307_v36, %v1493_v34 }
 0x161   :  { %1494 = vcosq.f32 %v1399_v18  ;;  %v1305_v43 = vsel %vm1303_vm15, %v1491_v23, %v1304_v37 }
 0x162   :  { %1496 = vsinq.f32 %v1399_v18  ;;  %v1309_v45 = vsel %vm1302_vm0, %v1305_v43, %v1308_v38 }
 0x163   :  { %v1310_v46 = vsel %vm1299_vm1, nan, %v1309_v45 }
 0x164   :  { %v1417_v50 = vadd.f32 0.0001, %v1310_v46 }
 0x166   :  { %1421 = vst [vmem:[#allocation5 + $0x10] sm:$0xff] %v1417_v50 }
 0x16e   :  { %v1495_v3 = vpop.eup %1494 }
 0x16f   :  { %v1497_v55 = vpop.eup %1496  ;;  %v1411_v57 = vxor.u32 2147483648, %v1495_v3 }
 0x170   :  { %v1408_v61 = vxor.u32 2147483648, %v1497_v55 }
 0x171   :  { %v1412_v54 = vsel %vm1410_vm2, %v1411_v57, %v1497_v55 }
 0x172   :  { %v1409_v47 = vsel %vm1407_vm3, %v1495_v3, %v1408_v61 }
 0x173   :  { %v1413_v20 = vsel %vm1406_vm4, %v1409_v47, %v1412_v54 }
 0x174   :  { %v1414_v49 = vsel %vm1403_vm5, nan, %v1413_v20 }
 0x175   :  { %v1418_v51 = vadd.f32 0.0001, %v1414_v49 }
 0x177   :  { %1423 = vst.msk [vmem:[#allocation5 + $0x18] sm:$0xff] %vm1422_vm6, %v1418_v51 }
 0x178   :  { %1529 = shalt.err (!%p1526_p9)
}
 0x179   :  { %1433 = dma.vmem_to_hbm [thread:$0]  %s1431_s19, 512, %s1886_s3, [#allocation4]  }
 0x17a   :  { %1540 = dma.done.wait [#allocation4], 512  }
 0x17b   :  { %1541 = vsyncadd [#allocation4], 4294966784 }
 0x17c   :  { %1437 = vsyncpa [#allocation3], 1 }
 0x17d   :  { %1438 = vsyncpa [#allocation4], 1 }

</bundles_post_ra>
